<compile_context>
chip_gen: v7x
topology: tpu7x:2x2x1
jax: 0.10.0
libtpu: 0.0.40
codegen_flags: <defaults>
</compile_context>

<pallas_src>
import functools

import jax
import jax.numpy as jnp
from jax import lax
from jax.experimental import pallas as pl
from jax.experimental.pallas import tpu as pltpu

BN_EPS = 1e-5
_LANE = 128
_SUBL_BF16 = 16  # bf16 sublane packing granularity


def _round_up(n, m):
    return ((n + m - 1) // m) * m


def _bn_relu(z, gamma, beta, inv_b):
    """BatchNorm1d (training-mode, biased batch stats) + ReLU.

    Single fused cross-sublane reduction over [z | z*z] concatenated along
    the lane axis; variance clamped at 0 to guard against cancellation.
    """
    n = z.shape[1]
    zz = jnp.concatenate([z, z * z], axis=1)          # (batch, 2n) one pass
    red = jnp.sum(zz, axis=0, keepdims=True)          # single sublane reduce
    s = red[:, :n]
    sq = red[:, n:]
    mean = s * inv_b
    var = jnp.maximum(sq * inv_b - mean * mean, 0.0)   # clamp: no NaN in rsqrt
    zhat = (z - mean) * lax.rsqrt(var + BN_EPS)
    return jnp.maximum(zhat * gamma + beta, 0.0)


def actor_kernel(x_ref, wpack_ref, pack_ref, out_ref, *,
                 batch, state_size, fc1_units, fc2_units, action_size,
                 action_pad, r1, r2):
    del action_size  # output uses the lane-padded width; wrapper slices it
    inv_b = jnp.float32(1.0 / batch)

    # Per-feature vectors packed in one tiny (8, W) f32 array:
    #   row 0: bn1 gamma   row 1: bn1 beta
    #   row 2: bn2 gamma   row 3: bn2 beta
    #   row 4: fc4 bias (zero-padded to action_pad lanes)  rows 5..7: unused
    pack = pack_ref[...]
    g1 = pack[0:1, :fc1_units]
    be1 = pack[1:2, :fc1_units]
    g2 = pack[2:3, :fc2_units]
    be2 = pack[3:4, :fc2_units]
    b4 = pack[4:5, :action_pad]

    x = x_ref[...]                                     # bf16 (cast in wrapper)

    # fc1 -> bn1 -> relu   (fc1 bias cancelled by BN mean subtraction)
    w1 = wpack_ref[0:state_size, :fc1_units]           # static ref-view load
    z1 = jnp.dot(x, w1, preferred_element_type=jnp.float32)
    h1 = _bn_relu(z1, g1, be1, inv_b)

    # fc2 -> bn2 -> relu   (fc2 bias cancelled by BN mean subtraction)
    w2 = wpack_ref[r1:r1 + fc1_units, :fc2_units]
    z2 = jnp.dot(h1.astype(jnp.bfloat16), w2,
                 preferred_element_type=jnp.float32)
    h2 = _bn_relu(z2, g2, be2, inv_b)

    # fc4 -> tanh          (fc3 / bn3 unused in the reference forward)
    # Output lanes padded to 128: padded weight/bias columns are zero, so the
    # extra lanes hold tanh(0) = 0 and the store is lane-dense.
    w4 = wpack_ref[r2:r2 + fc2_units, :action_pad]
    z4 = jnp.dot(h2.astype(jnp.bfloat16), w4,
                 preferred_element_type=jnp.float32) + b4
    out_ref[...] = jnp.tanh(z4)


def actor_forward(x, params):
    """x: (batch, state_size) float32; params from init_params()."""
    wpack, pack, dims = params
    batch = x.shape[0]
    if batch < 2:
        # PyTorch BatchNorm1d in training mode rejects batch size 1.
        raise ValueError("Actor forward needs batch >= 2 (training-mode BN).")

    state_size = dims["state_size"]
    fc1_units = dims["fc1_units"]
    fc2_units = dims["fc2_units"]
    action_size = dims["action_size"]
    action_pad = dims["action_pad"]

    vmem = pl.BlockSpec(memory_space=pltpu.MemorySpace.VMEM)

    flops = 2 * batch * (state_size * fc1_units
                         + fc1_units * fc2_units
                         + fc2_units * action_pad)
    transcendentals = batch * action_pad + 2 * (fc1_units + fc2_units)
    bytes_accessed = (2 * (x.size + wpack.size)            # bf16 inputs
                      + 4 * (pack.size + batch * action_pad))

    kernel = functools.partial(actor_kernel, batch=batch, **dims)

    # Single gridless call: BN statistics couple all rows of the batch, so the
    # whole batch stays inside one block. Raise the scoped-VMEM limit so large
    # amortized batches don't hit the 16/32 MiB defaults (64 MiB is the v7x
    # physical ceiling, so it is safe on every generation).
    out_pad = pl.pallas_call(
        kernel,
        out_shape=jax.ShapeDtypeStruct((batch, action_pad), jnp.float32),
        in_specs=[vmem, vmem, vmem],
        out_specs=vmem,
        compiler_params=pltpu.CompilerParams(vmem_limit_bytes=64 << 20),
        cost_estimate=pl.CostEstimate(
            flops=flops,
            transcendentals=transcendentals,
            bytes_accessed=bytes_accessed),
    )(x.astype(jnp.bfloat16), wpack, pack)

    return out_pad[:, :action_size]


def init_params(key, state_size, action_size, fc1_units, fc2_units):
    """Deterministic init mirroring the PyTorch module's reset_parameters().

    fc1/fc2 biases are intentionally NOT created: a per-feature bias added
    before a training-mode BatchNorm is exactly cancelled by the mean
    subtraction (differences only at f32 rounding level).
    """
    k1, k2, k3, kb4 = jax.random.split(key, 4)

    def uniform(k, shape, lim):
        return jax.random.uniform(k, shape, jnp.float32, -lim, lim)

    # hidden_init quirk preserved: fan_in = weight.size(0) = out_features.
    lim1 = 1.0 / (fc1_units ** 0.5)
    lim2 = 1.0 / (fc2_units ** 0.5)

    # Weights stored pre-transposed as (in_features, out_features).
    w1 = uniform(k1, (state_size, fc1_units), lim1)
    w2 = uniform(k2, (fc1_units, fc2_units), lim2)
    w4 = uniform(k3, (fc2_units, action_size), 0.003)
    # fc4 default PyTorch bias init: U(-1/sqrt(fan_in), 1/sqrt(fan_in)).
    b4 = uniform(kb4, (action_size,), 1.0 / (fc2_units ** 0.5))

    # --- pack the three weight matrices into ONE lane-padded bf16 array ----
    # rows [0 : state_size)        -> w1
    # rows [r1 : r1 + fc1_units)   -> w2
    # rows [r2 : r2 + fc2_units)   -> w4 (lanes beyond action_size are zero)
    r1 = _round_up(state_size, _SUBL_BF16)
    r2 = r1 + _round_up(fc1_units, _SUBL_BF16)
    rows = _round_up(r2 + fc2_units, _SUBL_BF16)
    width = _round_up(max(fc1_units, fc2_units, action_size), _LANE)
    action_pad = _round_up(action_size, _LANE)

    wpack = jnp.zeros((rows, width), jnp.bfloat16)
    wpack = wpack.at[0:state_size, :fc1_units].set(w1.astype(jnp.bfloat16))
    wpack = wpack.at[r1:r1 + fc1_units, :fc2_units].set(w2.astype(jnp.bfloat16))
    wpack = wpack.at[r2:r2 + fc2_units, :action_size].set(w4.astype(jnp.bfloat16))

    # --- pack bn1/bn2 affine params + fc4 bias into one f32 (8, W) array ----
    pack = jnp.zeros((8, width), jnp.float32)
    pack = pack.at[0, :fc1_units].set(1.0)   # bn1 gamma (fresh module: ones)
    #            row 1 stays zero            # bn1 beta
    pack = pack.at[2, :fc2_units].set(1.0)   # bn2 gamma
    #            row 3 stays zero            # bn2 beta
    pack = pack.at[4, :action_size].set(b4)  # fc4 bias (padded lanes = 0)

    dims = dict(state_size=state_size, fc1_units=fc1_units,
                fc2_units=fc2_units, action_size=action_size,
                action_pad=action_pad, r1=r1, r2=r2)
    return (wpack, pack, dims)


if __name__ == "__main__":
    # Small shapes consistent with the module's forward; real workloads should
    # amortize by pushing large batches through the same single call.
    batch = 32
    state_size = 16
    fc1_units = 64
    fc2_units = 64
    action_size = 8

    key = jax.random.PRNGKey(0)
    kx, kp = jax.random.split(key)

    x = jax.random.normal(kx, (batch, state_size), jnp.float32)
    params = init_params(kp, state_size, action_size, fc1_units, fc2_units)

    out = actor_forward(x, params)
    out = jax.block_until_ready(out)

    assert out.shape == (batch, action_size)
    assert bool(jnp.all(jnp.isfinite(out)))
    assert bool(jnp.all(jnp.abs(out) <= 1.0))  # tanh output range

    print("KERNEL_OK")
</pallas_src>

<mosaic_0001>
module attributes {stable_mosaic.version = 11 : i64} {
  func.func @actor_kernel(%arg0: memref<32x16xbf16, #tpu.memory_space<vmem>>, %arg1: memref<144x128xbf16, #tpu.memory_space<vmem>>, %arg2: memref<8x128xf32, #tpu.memory_space<vmem>>, %arg3: memref<32x128xf32, #tpu.memory_space<vmem>>) attributes {dimension_semantics = [], scalar_prefetch = 0 : i64, scratch_operands = 0 : i64, tpu.core_type = #tpu.core_type<tc>} {
    %c0 = arith.constant 0 : index
    %c0_0 = arith.constant 0 : index
    %0 = vector.load %arg2[%c0, %c0_0] : memref<8x128xf32, #tpu.memory_space<vmem>>, vector<8x128xf32>
    %1 = vector.extract_strided_slice %0 {offsets = [0, 0], sizes = [1, 64], strides = [1, 1]} : vector<8x128xf32> to vector<1x64xf32>
    %2 = vector.extract_strided_slice %0 {offsets = [1, 0], sizes = [1, 64], strides = [1, 1]} : vector<8x128xf32> to vector<1x64xf32>
    %3 = vector.extract_strided_slice %0 {offsets = [2, 0], sizes = [1, 64], strides = [1, 1]} : vector<8x128xf32> to vector<1x64xf32>
    %4 = vector.extract_strided_slice %0 {offsets = [3, 0], sizes = [1, 64], strides = [1, 1]} : vector<8x128xf32> to vector<1x64xf32>
    %5 = vector.extract_strided_slice %0 {offsets = [4, 0], sizes = [1, 128], strides = [1, 1]} : vector<8x128xf32> to vector<1x128xf32>
    %c0_1 = arith.constant 0 : index
    %c0_2 = arith.constant 0 : index
    %6 = vector.load %arg0[%c0_1, %c0_2] : memref<32x16xbf16, #tpu.memory_space<vmem>>, vector<32x16xbf16>
    %c0_3 = arith.constant 0 : index
    %c0_4 = arith.constant 0 : index
    %7 = vector.load %arg1[%c0_3, %c0_4] : memref<144x128xbf16, #tpu.memory_space<vmem>>, vector<16x64xbf16>
    %cst = arith.constant dense<0.000000e+00> : vector<32x64xf32>
    %8 = tpu.matmul %6, %7, %cst {dimension_numbers = #tpu.dot_dimension_numbers<[1], [0], [0], [1], [0, 0, 1, 1], [], []>} : vector<32x16xbf16>, vector<16x64xbf16>, vector<32x64xf32> -> vector<32x64xf32>
    %9 = arith.mulf %8, %8 : vector<32x64xf32>
    %10 = tpu.concatenate %8, %9 in 1 : vector<32x64xf32>, vector<32x64xf32> -> vector<32x128xf32>
    %cst_5 = arith.constant dense<0.000000e+00> : vector<128xf32>
    %11 = vector.multi_reduction <add>, %10, %cst_5 [0] : vector<32x128xf32> to vector<128xf32>
    %12 = vector.shape_cast %11 : vector<128xf32> to vector<1x128xf32>
    %13 = vector.extract_strided_slice %12 {offsets = [0, 0], sizes = [1, 64], strides = [1, 1]} : vector<1x128xf32> to vector<1x64xf32>
    %14 = vector.extract_strided_slice %12 {offsets = [0, 64], sizes = [1, 64], strides = [1, 1]} : vector<1x128xf32> to vector<1x64xf32>
    %cst_6 = arith.constant 3.125000e-02 : f32
    %15 = vector.broadcast %cst_6 : f32 to vector<1x64xf32>
    %16 = arith.mulf %13, %15 : vector<1x64xf32>
    %cst_7 = arith.constant 3.125000e-02 : f32
    %17 = vector.broadcast %cst_7 : f32 to vector<1x64xf32>
    %18 = arith.mulf %14, %17 : vector<1x64xf32>
    %19 = arith.mulf %16, %16 : vector<1x64xf32>
    %20 = arith.subf %18, %19 : vector<1x64xf32>
    %cst_8 = arith.constant 0.000000e+00 : f32
    %21 = vector.broadcast %cst_8 : f32 to vector<1x64xf32>
    %22 = arith.maximumf %20, %21 : vector<1x64xf32>
    %23 = vector.broadcast %16 : vector<1x64xf32> to vector<32x64xf32>
    %24 = arith.subf %8, %23 : vector<32x64xf32>
    %cst_9 = arith.constant 9.99999974E-6 : f32
    %25 = vector.broadcast %cst_9 : f32 to vector<1x64xf32>
    %26 = arith.addf %22, %25 : vector<1x64xf32>
    %27 = math.rsqrt %26 : vector<1x64xf32>
    %28 = vector.broadcast %27 : vector<1x64xf32> to vector<32x64xf32>
    %29 = arith.mulf %24, %28 : vector<32x64xf32>
    %30 = vector.broadcast %1 : vector<1x64xf32> to vector<32x64xf32>
    %31 = arith.mulf %29, %30 : vector<32x64xf32>
    %32 = vector.broadcast %2 : vector<1x64xf32> to vector<32x64xf32>
    %33 = arith.addf %31, %32 : vector<32x64xf32>
    %cst_10 = arith.constant 0.000000e+00 : f32
    %34 = vector.broadcast %cst_10 : f32 to vector<32x64xf32>
    %35 = arith.maximumf %33, %34 : vector<32x64xf32>
    %c16 = arith.constant 16 : index
    %c0_11 = arith.constant 0 : index
    %36 = vector.load %arg1[%c16, %c0_11] : memref<144x128xbf16, #tpu.memory_space<vmem>>, vector<64x64xbf16>
    %37 = arith.truncf %35 : vector<32x64xf32> to vector<32x64xbf16>
    %cst_12 = arith.constant dense<0.000000e+00> : vector<32x64xf32>
    %38 = tpu.matmul %37, %36, %cst_12 {dimension_numbers = #tpu.dot_dimension_numbers<[1], [0], [0], [1], [0, 0, 1, 1], [], []>} : vector<32x64xbf16>, vector<64x64xbf16>, vector<32x64xf32> -> vector<32x64xf32>
    %39 = arith.mulf %38, %38 : vector<32x64xf32>
    %40 = tpu.concatenate %38, %39 in 1 : vector<32x64xf32>, vector<32x64xf32> -> vector<32x128xf32>
    %cst_13 = arith.constant dense<0.000000e+00> : vector<128xf32>
    %41 = vector.multi_reduction <add>, %40, %cst_13 [0] : vector<32x128xf32> to vector<128xf32>
    %42 = vector.shape_cast %41 : vector<128xf32> to vector<1x128xf32>
    %43 = vector.extract_strided_slice %42 {offsets = [0, 0], sizes = [1, 64], strides = [1, 1]} : vector<1x128xf32> to vector<1x64xf32>
    %44 = vector.extract_strided_slice %42 {offsets = [0, 64], sizes = [1, 64], strides = [1, 1]} : vector<1x128xf32> to vector<1x64xf32>
    %cst_14 = arith.constant 3.125000e-02 : f32
    %45 = vector.broadcast %cst_14 : f32 to vector<1x64xf32>
    %46 = arith.mulf %43, %45 : vector<1x64xf32>
    %cst_15 = arith.constant 3.125000e-02 : f32
    %47 = vector.broadcast %cst_15 : f32 to vector<1x64xf32>
    %48 = arith.mulf %44, %47 : vector<1x64xf32>
    %49 = arith.mulf %46, %46 : vector<1x64xf32>
    %50 = arith.subf %48, %49 : vector<1x64xf32>
    %cst_16 = arith.constant 0.000000e+00 : f32
    %51 = vector.broadcast %cst_16 : f32 to vector<1x64xf32>
    %52 = arith.maximumf %50, %51 : vector<1x64xf32>
    %53 = vector.broadcast %46 : vector<1x64xf32> to vector<32x64xf32>
    %54 = arith.subf %38, %53 : vector<32x64xf32>
    %cst_17 = arith.constant 9.99999974E-6 : f32
    %55 = vector.broadcast %cst_17 : f32 to vector<1x64xf32>
    %56 = arith.addf %52, %55 : vector<1x64xf32>
    %57 = math.rsqrt %56 : vector<1x64xf32>
    %58 = vector.broadcast %57 : vector<1x64xf32> to vector<32x64xf32>
    %59 = arith.mulf %54, %58 : vector<32x64xf32>
    %60 = vector.broadcast %3 : vector<1x64xf32> to vector<32x64xf32>
    %61 = arith.mulf %59, %60 : vector<32x64xf32>
    %62 = vector.broadcast %4 : vector<1x64xf32> to vector<32x64xf32>
    %63 = arith.addf %61, %62 : vector<32x64xf32>
    %cst_18 = arith.constant 0.000000e+00 : f32
    %64 = vector.broadcast %cst_18 : f32 to vector<32x64xf32>
    %65 = arith.maximumf %63, %64 : vector<32x64xf32>
    %c80 = arith.constant 80 : index
    %c0_19 = arith.constant 0 : index
    %66 = vector.load %arg1[%c80, %c0_19] : memref<144x128xbf16, #tpu.memory_space<vmem>>, vector<64x128xbf16>
    %67 = arith.truncf %65 : vector<32x64xf32> to vector<32x64xbf16>
    %cst_20 = arith.constant dense<0.000000e+00> : vector<32x128xf32>
    %68 = tpu.matmul %67, %66, %cst_20 {dimension_numbers = #tpu.dot_dimension_numbers<[1], [0], [0], [1], [0, 0, 1, 1], [], []>} : vector<32x64xbf16>, vector<64x128xbf16>, vector<32x128xf32> -> vector<32x128xf32>
    %69 = vector.broadcast %5 : vector<1x128xf32> to vector<32x128xf32>
    %70 = arith.addf %68, %69 : vector<32x128xf32>
    %71 = math.tanh %70 : vector<32x128xf32>
    %c0_21 = arith.constant 0 : index
    %c0_22 = arith.constant 0 : index
    %72 = vector.load %arg3[%c0_21, %c0_22] : memref<32x128xf32, #tpu.memory_space<vmem>>, vector<32x128xf32>
    tpu.vector_store %arg3[%c0_21, %c0_22], %71 {strides = array<i32>} : memref<32x128xf32, #tpu.memory_space<vmem>>, vector<32x128xf32>,
    return
  }
}

</mosaic_0001>

<bundles_post_ra>
// kernel: tpu_custom_call.1
= control target key start
LH: loop header
LB: loop body
LE: loop exit
PB: predicated region body
PF: predicated region fallthrough
CT: control target
= control target key end

     0   :  { %8 = vsyncpa [#allocation3], 0  ;;  %s848_s0 = inlined_call_operand.hbm [shape: bf16[32,16], index: 0, kind: input, shape index: {}]   ;;  %s849_s1 = inlined_call_operand.hbm [shape: bf16[144,128], index: 1, kind: input, shape index: {}]   ;;  %s850_s2 = inlined_call_operand.hbm [shape: f32[8,128], index: 2, kind: input, shape index: {}]   ;;  %s851_s3 = inlined_call_operand.hbm [shape: f32[32,128], index: 3, kind: output, shape index: {}]  }
   0x1   :  { %9 = vsyncpa [#allocation6], 0 }
   0x2   :  { %10 = vsyncpa [#allocation4], 0  ;;  %s688_s12 = smov [#allocation5]   ;;  %s689_s14 = smov [#allocation2]  }
   0x3   :  { %s28_s13 = sshll.u32 %s688_s12, 4  ;;  %s16_s15 = sshll.u32 %s689_s14, 4  ;;  %s29_s13 = int_to_ptr.vmem [resolvable:$true] %s28_s13  ;;  %s716_s15 = int_to_ptr.vmem [resolvable:$true] %s16_s15 }
   0x4   :  { %s594_s18 = scalar_lea.hbm %s849_s1, 1152 }
   0x5   :  { %p595_p0 = scmp.ne.s32.totalorder %s849_s1, %s594_s18  ;;  %p598_p1 = scmp.lt.u32.totalorder %s594_s18, %s849_s1 }
   0x7   :  { %p600_p2 = pnand %p598_p1, %p595_p0 }
   0x9   :  { %603 = shalt.err (!%p600_p2)
}
   0xa   :  { %s604_s23 = scalar_lea.vmem %s29_s13, 1152  ;;  %p609_p4 = scmp.lt.s32.totalorder %s29_s13, %s29_s13 }
   0xb   :  { %p605_p3 = scmp.ne.s32.totalorder %s29_s13, %s604_s23  ;;  %p610_p5 = scmp.lt.s32.totalorder %s604_s23, %s604_s23 }
   0xd   :  { %p611_p6 = por %p610_p5, %p609_p4 }
   0xf   :  { %p612_p7 = pnand %p611_p6, %p605_p3 }
  0x11   :  { %615 = shalt.err (!%p612_p7)
}
  0x12   :  { %s690_s24 = smov 64   ;;  %s691_s25 = smov 4  }
  0x13   :  { %34 = dma.hbm_to_vmem [thread:$0]  %s849_s1, 1152, %s29_s13, [#allocation6], %s690_s24, %s690_s24, %s691_s25  }
  0x14   :  { %s616_s30 = scalar_lea.hbm %s848_s0, 256 }
  0x15   :  { %p617_p8 = scmp.ne.s32.totalorder %s848_s0, %s616_s30  ;;  %p620_p9 = scmp.lt.u32.totalorder %s616_s30, %s848_s0 }
  0x17   :  { %p622_p10 = pnand %p620_p9, %p617_p8 }
  0x19   :  { %625 = shalt.err (!%p622_p10)
}
  0x1a   :  { %s626_s8 = scalar_lea.vmem %s716_s15, 256  ;;  %p631_p12 = scmp.lt.s32.totalorder %s716_s15, %s716_s15 }
  0x1b   :  { %p627_p11 = scmp.ne.s32.totalorder %s716_s15, %s626_s8  ;;  %p632_p13 = scmp.lt.s32.totalorder %s626_s8, %s626_s8 }
  0x1d   :  { %p633_p0 = por %p632_p13, %p631_p12 }
  0x1f   :  { %p634_p1 = pnand %p633_p0, %p627_p11 }
  0x21   :  { %637 = shalt.err (!%p634_p1)
}
  0x22   :  { %22 = dma.hbm_to_vmem [thread:$0]  %s848_s0, 256, %s716_s15, [#allocation3], %s690_s24, %s690_s24, %s691_s25  }
  0x23   :  { %s692_s10 = smov [#allocation7]   ;;  %s638_s14 = scalar_lea.hbm %s850_s2, 128 }
  0x24   :  { %s41_s11 = sshll.u32 %s692_s10, 4  ;;  %p639_p2 = scmp.ne.s32.totalorder %s850_s2, %s638_s14  ;;  %s42_s11 = int_to_ptr.vmem [resolvable:$true] %s41_s11 }
  0x25   :  { %p642_p3 = scmp.lt.u32.totalorder %s638_s14, %s850_s2 }
  0x27   :  { %p644_p4 = pnand %p642_p3, %p639_p2 }
  0x29   :  { %647 = shalt.err (!%p644_p4)
}
  0x2a   :  { %s648_s20 = scalar_lea.vmem %s42_s11, 128  ;;  %p653_p6 = scmp.lt.s32.totalorder %s42_s11, %s42_s11 }
  0x2b   :  { %p649_p5 = scmp.ne.s32.totalorder %s42_s11, %s648_s20  ;;  %p654_p7 = scmp.lt.s32.totalorder %s648_s20, %s648_s20 }
  0x2d   :  { %p655_p8 = por %p654_p7, %p653_p6 }
  0x2f   :  { %p656_p9 = pnand %p655_p8, %p649_p5 }
  0x31   :  { %659 = shalt.err (!%p656_p9)
}
  0x32   :  { %44 = dma.hbm_to_vmem [thread:$0]  %s850_s2, 128, %s42_s11, [#allocation6]  }
  0x33   :  { %682 = dma.done.wait [#allocation3], 256  }
  0x34   :  { %683 = vsyncadd [#allocation3], 4294967040 }
  0x35   :  { %684 = dma.done.wait [#allocation6], 1280  }
  0x36   :  { %685 = vsyncadd [#allocation6], 4294966016  ;;  %v571_v0 = vld [vmem:[#allocation5] sm:$0xff]   ;;  %vm78_vm0 = vcmask 130048   ;;  %v572_v1 = vld [vmem:[#allocation2] sm:$0xff]   ;;  %vm154_vm1 = vcmask 523264   ;;  %v182_v36 = vlaneseq }
  0x37   :  { %533 = vmatprep.subr.bf16.mxu0 %v571_v0  ;;  %v573_v2 = vld [vmem:[#allocation2 + $0x8] sm:$0xff]   ;;  %535 = vmatprep.mubr.msk.bf16.mxu0 %vm78_vm0, %v572_v1  ;;  %v574_v30 = vld [vmem:[#allocation5 + $0x8] sm:$0xff]   ;;  %v575_v31 = vld [vmem:[#allocation5 + $0x10] sm:$0xff]   ;;  %s693_s2 = smov [#allocation8]  }
  0x38   :  { %534 = vmatpush3.bf16.msra.mxu0 %v571_v0  ;;  %539 = vmatprep.subr.bf16.mxu1 %v574_v30  ;;  %v576_v37 = vld [vmem:[#allocation5 + $0x18] sm:$0xff]   ;;  %v787_v38 = vshrl.u32 %v182_v36, 7  ;;  %v577_v39 = vld [vmem:[#allocation5 + $0x20] sm:$0xff]   ;;  %v794_v43 = vld [vmem:[#allocation7] sm:$0xff]  ;;  %s488_s21 = sshll.u32 %s693_s2, 4  ;;  %s489_s21 = int_to_ptr.vmem [resolvable:$true] %s488_s21 }
  0x39   :  { %540 = vmatpush3.bf16.msra.mxu1 %v574_v30  ;;  %s660_s22 = scalar_lea.vmem %s489_s21, 512  ;;  %p665_p11 = scmp.lt.s32.totalorder %s489_s21, %s489_s21 }
  0x3a   :  { %541 = vmatprep.subr.bf16.mxu1 %v575_v31  ;;  %v790_v40 = vsub.s32 0, %v787_v38  ;;  %v204_v44 = vsub.s32 1, %v787_v38  ;;  %p661_p10 = scmp.ne.s32.totalorder %s489_s21, %s660_s22  ;;  %p666_p12 = scmp.lt.s32.totalorder %s660_s22, %s660_s22 }
  0x3b   :  { %536 = vmatmul.mubr.msk.bf16.vlgmr.msra.gmra.mrb[0].mxu0 %vm78_vm0, %v573_v2 }
  0x3c   :  { %v197_v46 = vrot.slane %v794_v43, %v790_v40  ;;  %v205_v51 = vrot.slane %v794_v43, %v204_v44  ;;  %p667_p13 = por %p666_p12, %p665_p11 }
  0x3d   :  { %542 = vmatpush3.bf16.msra.mxu1 %v575_v31 }
  0x3e   :  { %543 = vmatprep.subr.bf16.mxu1 %v576_v37  ;;  %p668_p0 = pnand %p667_p13, %p661_p10 }
  0x41   :  { %544 = vmatpush3.bf16.msra.mxu1 %v576_v37 }
  0x42   :  { %545 = vmatprep.subr.bf16.mxu1 %v577_v39 }
  0x45   :  { %546 = vmatpush3.bf16.msra.mxu1 %v577_v39 }
 0x10e   :  { %v763_v3 = vpop.f32.mrb[0].mxu0 }
 0x10f   :  { %v765_v4 = vpop.f32.mrb[1].mxu0  ;;  %v136_v5 = vmul.f32 %v763_v3, %v763_v3 }
 0x110   :  { %v769_v6 = vpop.f32.mrb[2].mxu0  ;;  %v134_v7 = vmul.f32 %v765_v4, %v765_v4 }
 0x111   :  { %146 = vrot.lane.b32.xlu1 %v136_v5, %s690_s24  ;;  %v122_v8 = vpop.f32.mrb[3].mxu0  ;;  %v137_v9 = vmul.f32 %v769_v6, %v769_v6 }
 0x112   :  { %142 = vrot.lane.b32.xlu0 %v134_v7, %s690_s24  ;;  %v135_v10 = vmul.f32 %v122_v8, %v122_v8 }
 0x115   :  { %148 = vrot.lane.b32.xlu1 %v137_v9, %s690_s24 }
 0x116   :  { %144 = vrot.lane.b32.xlu0 %v135_v10, %s690_s24 }
 0x183   :  { %v147_v11 = vpop.permute.xlu1 %146 }
 0x184   :  { %v143_v12 = vpop.permute.xlu0 %142  ;;  %v157_v18 = vsel %vm154_vm1, %v763_v3, %v147_v11 }
 0x185   :  { %v155_v14 = vsel %vm154_vm1, %v765_v4, %v143_v12 }
 0x187   :  { %v149_v16 = vpop.permute.xlu1 %148 }
 0x188   :  { %v145_v13 = vpop.permute.xlu0 %144  ;;  %v158_v20 = vsel %vm154_vm1, %v769_v6, %v149_v16 }
 0x189   :  { %v156_v15 = vsel %vm154_vm1, %v122_v8, %v145_v13 }
 0x18a   :  { %v159_v17 = vadd.f32 %v156_v15, %v155_v14 }
 0x18c   :  { %v160_v19 = vadd.f32 %v159_v17, %v157_v18 }
 0x18e   :  { %v161_v21 = vadd.f32 %v160_v19, %v158_v20 }
 0x190   :  { %v162_v22 = vrot.slane %v161_v21, 4 }
 0x192   :  { %v163_v23 = vadd.f32 %v162_v22, %v161_v21 }
 0x194   :  { %v164_v24 = vrot.slane %v163_v23, 2 }
 0x196   :  { %v165_v25 = vadd.f32 %v164_v24, %v163_v23 }
 0x198   :  { %v166_v26 = vrot.slane %v165_v25, 1 }
 0x19a   :  { %v167_v27 = vadd.f32 %v166_v26, %v165_v25 }
 0x19c   :  { %v168_v28 = vmul.f32 0.03125, %v167_v27 }
 0x19e   :  { %v169_v29 = vmul.f32 %v168_v28, %v168_v28  ;;  %v176_v45 = vsub.f32 %v765_v4, %v168_v28  ;;  %v177_v47 = vsub.f32 %v122_v8, %v168_v28  ;;  %v178_v48 = vsub.f32 %v763_v3, %v168_v28 }
 0x19f   :  { %v179_v49 = vsub.f32 %v769_v6, %v168_v28 }
 0x1a0   :  { %171 = vrot.lane.b32.xlu0 %v169_v29, %s690_s24 }
 0x212   :  { %v172_v32 = vpop.permute.xlu0 %171 }
 0x213   :  { %v174_v33 = vsub.f32 %v168_v28, %v172_v32 }
 0x215   :  { %v175_v34 = vmax.f32 %v174_v33, 0.0  ;;  %v578_v33 = vld [vmem:[#allocation5 + $0x28] sm:$0xff]  }
 0x216   :  { %551 = vmatprep.subr.bf16.mxu0 %v578_v33 }
 0x217   :  { %v180_v35 = vadd.f32 1e-05, %v175_v34  ;;  %v579_v34 = vld [vmem:[#allocation5 + $0x30] sm:$0xff]   ;;  %552 = vmatpush3.bf16.msra.mxu0 %v578_v33 }
 0x218   :  { %553 = vmatprep.subr.bf16.mxu0 %v579_v34 }
 0x219   :  { %582 = vrsqrt.f32 %v180_v35 }
 0x21b   :  { %554 = vmatpush3.bf16.msra.mxu0 %v579_v34 }
 0x223   :  { %v583_v41 = vpop.eup %582 }
 0x224   :  { %v185_v42 = vrot.slane %v583_v41, %v790_v40  ;;  %v580_v41 = vld [vmem:[#allocation5 + $0x38] sm:$0xff]  }
 0x225   :  { %555 = vmatprep.subr.bf16.mxu0 %v580_v41 }
 0x226   :  { %187 = vrot.lane.b32.xlu1 %v185_v42, %s690_s24  ;;  %556 = vmatpush3.bf16.msra.mxu0 %v580_v41  ;;  %v581_v42 = vld [vmem:[#allocation5 + $0x40] sm:$0xff]  }
 0x227   :  { %557 = vmatprep.subr.bf16.mxu0 %v581_v42 }
 0x22a   :  { %558 = vmatpush3.bf16.msra.mxu0 %v581_v42 }
 0x298   :  { %v188_v50 = vpop.permute.xlu1 %187 }
 0x299   :  { %v190_v52 = vmul.f32 %v188_v50, %v176_v45  ;;  %v191_v53 = vmul.f32 %v188_v50, %v177_v47  ;;  %v192_v54 = vmul.f32 %v188_v50, %v178_v48  ;;  %v193_v55 = vmul.f32 %v188_v50, %v179_v49 }
 0x29a   :  { %v372_v47 = vsub.s32 3, %v787_v38 }
 0x29b   :  { %v200_v56 = vmul.f32 %v197_v46, %v192_v54  ;;  %v201_v57 = vmul.f32 %v197_v46, %v193_v55  ;;  %v198_v58 = vmul.f32 %v197_v46, %v190_v52  ;;  %v199_v59 = vmul.f32 %v197_v46, %v191_v53 }
 0x29c   :  { %v364_v46 = vsub.s32 2, %v787_v38  ;;  %v373_v53 = vrot.slane %v794_v43, %v372_v47 }
 0x29d   :  { %v208_v60 = vadd.f32 %v205_v51, %v200_v56  ;;  %v209_v61 = vadd.f32 %v205_v51, %v201_v57  ;;  %v206_v62 = vadd.f32 %v205_v51, %v198_v58  ;;  %v207_v63 = vadd.f32 %v205_v51, %v199_v59 }
 0x29e   :  { %v365_v52 = vrot.slane %v794_v43, %v364_v46 }
 0x29f   :  { %v210_v0 = vmax.f32 %v206_v62, 0.0  ;;  %v211_v1 = vmax.f32 %v207_v63, 0.0  ;;  %v212_v2 = vmax.f32 %v208_v60, 0.0  ;;  %v213_v3 = vmax.f32 %v209_v61, 0.0 }
 0x2a1   :  { %v222_v4 = vpack.c.bf16 %v211_v1, %v210_v0  ;;  %v223_v5 = vpack.c.bf16 %v213_v3, %v212_v2 }
 0x2a3   :  { %547 = vmatprep.mubr.msk.bf16.mxu1 %vm154_vm1, %v222_v4 }
 0x2a4   :  { %548 = vmatmul.mubr.msk.bf16.vlgmr.msra.gmra.mrb[0].mxu1 %vm154_vm1, %v223_v5 }
 0x377   :  { %v805_v6 = vpop.f32.mrb[0].mxu1 }
 0x378   :  { %v288_v7 = vpop.f32.mrb[1].mxu1  ;;  %v305_v12 = vmul.f32 %v805_v6, %v805_v6 }
 0x379   :  { %v807_v8 = vpop.f32.mrb[2].mxu1  ;;  %v303_v9 = vmul.f32 %v288_v7, %v288_v7 }
 0x37a   :  { %v291_v10 = vpop.f32.mrb[3].mxu1  ;;  %v306_v13 = vmul.f32 %v807_v8, %v807_v8 }
 0x37b   :  { %311 = vrot.lane.b32.xlu0 %v303_v9, %s690_s24  ;;  %v304_v11 = vmul.f32 %v291_v10, %v291_v10 }
 0x37d   :  { %313 = vrot.lane.b32.xlu1 %v304_v11, %s690_s24 }
 0x37f   :  { %315 = vrot.lane.b32.xlu0 %v305_v12, %s690_s24 }
 0x381   :  { %317 = vrot.lane.b32.xlu1 %v306_v13, %s690_s24 }
 0x3ed   :  { %v312_v14 = vpop.permute.xlu0 %311 }
 0x3ee   :  { %v323_v16 = vsel %vm154_vm1, %v288_v7, %v312_v14 }
 0x3ef   :  { %v314_v15 = vpop.permute.xlu1 %313 }
 0x3f0   :  { %v324_v17 = vsel %vm154_vm1, %v291_v10, %v314_v15 }
 0x3f1   :  { %v327_v18 = vadd.f32 %v324_v17, %v323_v16  ;;  %v316_v19 = vpop.permute.xlu0 %315 }
 0x3f2   :  { %v325_v20 = vsel %vm154_vm1, %v805_v6, %v316_v19 }
 0x3f3   :  { %v328_v21 = vadd.f32 %v327_v18, %v325_v20  ;;  %v318_v22 = vpop.permute.xlu1 %317 }
 0x3f4   :  { %v326_v23 = vsel %vm154_vm1, %v807_v8, %v318_v22 }
 0x3f5   :  { %v329_v24 = vadd.f32 %v328_v21, %v326_v23 }
 0x3f7   :  { %v330_v25 = vrot.slane %v329_v24, 4 }
 0x3f9   :  { %v331_v26 = vadd.f32 %v330_v25, %v329_v24 }
 0x3fb   :  { %v332_v27 = vrot.slane %v331_v26, 2 }
 0x3fd   :  { %v333_v28 = vadd.f32 %v332_v27, %v331_v26 }
 0x3ff   :  { %v334_v29 = vrot.slane %v333_v28, 1 }
 0x401   :  { %v335_v30 = vadd.f32 %v334_v29, %v333_v28 }
 0x403   :  { %v336_v31 = vmul.f32 0.03125, %v335_v30 }
 0x405   :  { %v337_v32 = vmul.f32 %v336_v31, %v336_v31  ;;  %v344_v48 = vsub.f32 %v288_v7, %v336_v31  ;;  %v345_v49 = vsub.f32 %v291_v10, %v336_v31  ;;  %v346_v50 = vsub.f32 %v805_v6, %v336_v31 }
 0x406   :  { %v347_v51 = vsub.f32 %v807_v8, %v336_v31  ;;  %v394_v8 = vsub.s32 4, %v787_v38 }
 0x407   :  { %339 = vrot.lane.b32.xlu0 %v337_v32, %s690_s24 }
 0x408   :  { %v395_v9 = vrot.slane %v794_v43, %v394_v8 }
 0x479   :  { %v340_v35 = vpop.permute.xlu0 %339 }
 0x47a   :  { %v342_v36 = vsub.f32 %v336_v31, %v340_v35 }
 0x47c   :  { %v343_v37 = vmax.f32 %v342_v36, 0.0 }
 0x47e   :  { %v348_v39 = vadd.f32 1e-05, %v343_v37 }
 0x480   :  { %584 = vrsqrt.f32 %v348_v39 }
 0x48a   :  { %v585_v44 = vpop.eup %584 }
 0x48b   :  { %v353_v45 = vrot.slane %v585_v44, %v790_v40 }
 0x48d   :  { %355 = vrot.lane.b32.xlu1 %v353_v45, %s690_s24 }
 0x4ff   :  { %v356_v54 = vpop.permute.xlu1 %355 }
 0x500   :  { %v358_v55 = vmul.f32 %v356_v54, %v344_v48  ;;  %v359_v56 = vmul.f32 %v356_v54, %v345_v49  ;;  %v360_v40 = vmul.f32 %v356_v54, %v346_v50  ;;  %v361_v57 = vmul.f32 %v356_v54, %v347_v51 }
 0x502   :  { %v366_v58 = vmul.f32 %v365_v52, %v358_v55  ;;  %v367_v59 = vmul.f32 %v365_v52, %v359_v56  ;;  %v368_v60 = vmul.f32 %v365_v52, %v360_v40  ;;  %v369_v61 = vmul.f32 %v365_v52, %v361_v57 }
 0x504   :  { %v374_v62 = vadd.f32 %v373_v53, %v366_v58  ;;  %v375_v63 = vadd.f32 %v373_v53, %v367_v59  ;;  %v376_v0 = vadd.f32 %v373_v53, %v368_v60  ;;  %v377_v1 = vadd.f32 %v373_v53, %v369_v61 }
 0x506   :  { %v378_v2 = vmax.f32 %v374_v62, 0.0  ;;  %v379_v3 = vmax.f32 %v375_v63, 0.0  ;;  %v380_v4 = vmax.f32 %v376_v0, 0.0  ;;  %v381_v5 = vmax.f32 %v377_v1, 0.0 }
 0x508   :  { %v391_v6 = vpack.c.bf16 %v381_v5, %v380_v4  ;;  %v390_v7 = vpack.c.bf16 %v379_v3, %v378_v2 }
 0x50a   :  { %559 = vmatprep.mubr.msk.bf16.mxu0 %vm154_vm1, %v390_v7 }
 0x50b   :  { %560 = vmatmul.mubr.msk.bf16.vlgmr.msra.gmra.mrb[4].mxu0 %vm154_vm1, %v391_v6 }
 0x5de   :  { %v561_v10 = vpop.f32.mrb[4].mxu0 }
 0x5df   :  { %v469_v11 = vadd.f32 %v561_v10, %v395_v9  ;;  %v460_v12 = vpop.f32.mrb[5].mxu0 }
 0x5e0   :  { %v461_v13 = vadd.f32 %v460_v12, %v395_v9  ;;  %v562_v14 = vpop.f32.mrb[6].mxu0 }
 0x5e1   :  { %586 = vtanh.f32 %v469_v11  ;;  %v472_v15 = vadd.f32 %v562_v14, %v395_v9  ;;  %v463_v16 = vpop.f32.mrb[7].mxu0 }
 0x5e2   :  { %588 = vtanh.f32 %v461_v13  ;;  %v464_v17 = vadd.f32 %v463_v16, %v395_v9 }
 0x5e3   :  { %590 = vtanh.f32 %v472_v15 }
 0x5e4   :  { %592 = vtanh.f32 %v464_v17 }
 0x5eb   :  { %v587_v18 = vpop.eup %586 }
 0x5ec   :  { %v589_v19 = vpop.eup %588  ;;  %481 = vst [vmem:[#allocation8 + $0x10] sm:$0xff] %v587_v18 }
 0x5ed   :  { %v591_v38 = vpop.eup %590  ;;  %479 = vst [vmem:[#allocation8] sm:$0xff] %v589_v19 }
 0x5ee   :  { %v593_v43 = vpop.eup %592  ;;  %482 = vst [vmem:[#allocation8 + $0x18] sm:$0xff] %v591_v38 }
 0x5ef   :  { %480 = vst [vmem:[#allocation8 + $0x8] sm:$0xff] %v593_v43 }
 0x5f0   :  { %671 = shalt.err (!%p668_p0)
}
 0x5f1   :  { %s672_s25 = scalar_lea.hbm %s851_s3, 512 }
 0x5f2   :  { %p673_p1 = scmp.ne.s32.totalorder %s851_s3, %s672_s25  ;;  %p676_p2 = scmp.lt.u32.totalorder %s672_s25, %s851_s3 }
 0x5f4   :  { %p678_p3 = pnand %p676_p2, %p673_p1 }
 0x5f6   :  { %681 = shalt.err (!%p678_p3)
}
 0x5f7   :  { %s694_s30 = smov 128   ;;  %s695_s4 = smov 8  }
 0x5f8   :  { %494 = dma.vmem_to_hbm [thread:$0]  %s489_s21, 512, %s851_s3, [#allocation4], %s694_s30, %s694_s30, %s695_s4  }
 0x5f9   :  { %686 = dma.done.wait [#allocation4], 512  }
 0x5fa   :  { %687 = vsyncadd [#allocation4], 4294966784 }
 0x5fb   :  { %498 = vsyncpa [#allocation3], 1 }
 0x5fc   :  { %499 = vsyncpa [#allocation6], 1 }
 0x5fd   :  { %500 = vsyncpa [#allocation4], 1 }

</bundles_post_ra>
